<compile_context>
chip_gen: v7x
topology: tpu7x:2x2x1
jax: 0.10.0
libtpu: 0.0.40
codegen_flags: <defaults>
</compile_context>

<pallas_src>
import functools
import math

import numpy as np

import jax
import jax.numpy as jnp
from jax import lax
from jax.experimental import pallas as pl
from jax.experimental.pallas import tpu as pltpu


def _pick_tile_rows(total_rows: int, row_bytes: int) -> int:
    """Rows per output block.

    ~<=4 MiB per block (<=8 MiB double-buffered; tiny on v5e/v6e's 128 MiB
    VMEM and comfortably under v7x's 32 MiB scoped default), and >=4 tiles
    once the problem is big enough that both v7x TensorCores should get work.
    """
    if total_rows <= 1024:
        return total_rows                                   # single tile == full dim
    budget = max(16, ((4 << 20) // row_bytes) // 16 * 16)   # VMEM-budgeted rows
    target = ((total_rows + 3) // 4 + 15) // 16 * 16        # ~4 tiles, sublane aligned
    return min(budget, target)


def _pos_emb_kernel_packed(tab_ref, out_ref, *, tile_r: int, pack: int, shift: int):
    """Lane-dense path (out_dim < 128 and out_dim | 128).

    out_ref block: (tile_r, 128); each 128-lane row packs `pack = 128/out_dim`
    consecutive positions.  tab_ref: (2, 128) = [tiled inv_full; tiled phase].
    One full-width sin, one unmasked 128-lane store.
    """
    base_row = pl.program_id(0) * tile_r
    row = lax.broadcasted_iota(jnp.int32, (tile_r, 128), 0) + base_row
    lane = lax.broadcasted_iota(jnp.int32, (tile_r, 128), 1)
    pos = (row * pack + (lane >> shift)).astype(jnp.float32)   # position per element
    inv = tab_ref[0:1, :]                                       # (1, 128)
    phase = tab_ref[1:2, :]
    out_ref[...] = jnp.sin(pos * inv + phase).astype(out_ref.dtype)


def _pos_emb_kernel_rowmajor(tab_ref, out_ref, *, tile_s: int, out_dim: int):
    """General path.  out_ref block: (1, tile_s, out_dim); tab_ref: (2, out_dim)."""
    base = pl.program_id(0) * tile_s
    pos = (lax.broadcasted_iota(jnp.int32, (tile_s, out_dim), 0) + base).astype(jnp.float32)
    inv = tab_ref[0:1, :]
    phase = tab_ref[1:2, :]
    # cos(x) == sin(x + pi/2): one transcendental per element, one full-width store.
    out_ref[0, :, :] = jnp.sin(pos * inv + phase).astype(out_ref.dtype)


def positional_embedding(x: jax.Array, dim: int, scale: float = 1.0,
                         out_dtype=jnp.float32) -> jax.Array:
    """Returns (1, seq_len, 2*(dim//2)) sinusoidal embedding; seq_len = x.shape[1].

    Matches the PyTorch reference (including the 2*(dim//2) width for odd
    `dim`).  `out_dtype=jnp.bfloat16` halves HBM-store bytes but deviates from
    the f32 reference, so it is opt-in.
    """
    seq_len = x.shape[1]
    half = dim // 2
    assert half > 1, "dim must be >= 4 (reference divides by half_dim - 1)"
    out_dim = 2 * half
    itemsize = jnp.dtype(out_dtype).itemsize

    # Trace-time constants: inv_freq duplicated for the sin|cos halves, plus a
    # phase vector implementing cos(x) = sin(x + pi/2).
    log_scale = np.float32(math.log(10000.0) / (half - 1))
    inv = np.exp(np.arange(half, dtype=np.float32) * -log_scale).astype(np.float32)
    inv_full = np.concatenate([inv, inv])                                  # (out_dim,)
    phase = np.concatenate([np.zeros(half, np.float32),
                            np.full(half, np.pi / 2, np.float32)])         # (out_dim,)

    params = pltpu.CompilerParams(dimension_semantics=("parallel",))

    if out_dim < 128 and 128 % out_dim == 0:
        # Lane-dense slab: pack 128/out_dim consecutive positions per 128-lane
        # row so every vst is unmasked and every vreg fully occupied; reshape
        # back outside the kernel (contiguous, free).
        pack = 128 // out_dim
        rows_total = pl.cdiv(seq_len, pack)
        tab = jnp.asarray(np.stack([np.tile(inv_full, pack),
                                    np.tile(phase, pack)]))                # (2, 128)
        tile_r = _pick_tile_rows(rows_total, 128 * itemsize)
        grid = (pl.cdiv(rows_total, tile_r),)
        kernel = functools.partial(_pos_emb_kernel_packed, tile_r=tile_r,
                                   pack=pack, shift=int(out_dim).bit_length() - 1)
        flat = pl.pallas_call(
            kernel,
            out_shape=jax.ShapeDtypeStruct((rows_total, 128), out_dtype),
            grid=grid,
            in_specs=[pl.BlockSpec((2, 128), lambda i: (0, 0))],
            out_specs=pl.BlockSpec((tile_r, 128), lambda i: (i, 0)),
            compiler_params=params,
        )(tab)
        return flat.reshape(rows_total * pack, out_dim)[:seq_len][None]

    # General (out_dim >= 128 or non-divisor) path: row-major blocks, single
    # full-width store per tile.
    tab = jnp.asarray(np.stack([inv_full, phase]))                         # (2, out_dim)
    tile_s = _pick_tile_rows(seq_len, out_dim * itemsize)
    grid = (pl.cdiv(seq_len, tile_s),)
    kernel = functools.partial(_pos_emb_kernel_rowmajor, tile_s=tile_s, out_dim=out_dim)
    return pl.pallas_call(
        kernel,
        out_shape=jax.ShapeDtypeStruct((1, seq_len, out_dim), out_dtype),
        grid=grid,
        in_specs=[pl.BlockSpec((2, out_dim), lambda i: (0, 0))],
        out_specs=pl.BlockSpec((1, tile_s, out_dim), lambda i: (0, i, 0)),
        compiler_params=params,
    )(tab)


def _reference(seq_len: int, dim: int) -> jax.Array:
    half = dim // 2
    emb = math.log(10000.0) / (half - 1)
    inv = jnp.exp(jnp.arange(half, dtype=jnp.float32) * -emb)
    ang = jnp.outer(jnp.arange(seq_len, dtype=jnp.float32), inv)
    return jnp.concatenate([jnp.sin(ang), jnp.cos(ang)], axis=-1)[None]


def _assert_close(out, ref, max_pos):
    # cos is realized as sin(x + pi/2); for angles up to ~max_pos the f32
    # phase-add contributes O(ulp(max_pos)) absolute error vs. the direct-cos
    # reference (same order as the reference's own f32 rounding of pos*inv).
    atol = max(2e-5, 4.0 * float(np.spacing(np.float32(max(max_pos, 1.0)))))
    np.testing.assert_allclose(np.asarray(out), np.asarray(ref), atol=atol, rtol=1e-4)


if __name__ == "__main__":
    key = jax.random.PRNGKey(0)

    # Shapes implied by the module: batch=2, seq=8, hidden(dim)=32.
    B, S, D = 2, 8, 32
    x = jax.random.normal(key, (B, S, D), dtype=jnp.float32)
    out = jax.block_until_ready(positional_embedding(x, dim=D, scale=1.0))
    assert out.shape == (1, S, D), out.shape
    assert out.dtype == jnp.float32
    _assert_close(out, _reference(S, D), max_pos=S)

    # Lane-packed path (out_dim=32 < 128): multi-tile grid with ragged last block.
    S2 = 5000
    out2 = jax.block_until_ready(
        positional_embedding(jnp.zeros((1, S2, D), jnp.float32), dim=D))
    assert out2.shape == (1, S2, D)
    _assert_close(out2, _reference(S2, D), max_pos=S2)

    # Row-major path (out_dim >= 128): multi-tile grid with ragged last block.
    S3, D3 = 3000, 256
    out3 = jax.block_until_ready(
        positional_embedding(jnp.zeros((1, S3, D3), jnp.float32), dim=D3))
    assert out3.shape == (1, S3, D3)
    _assert_close(out3, _reference(S3, D3), max_pos=S3)

    print("KERNEL_OK")
</pallas_src>

<mosaic_0001>
module attributes {stable_mosaic.version = 11 : i64} {
  func.func @_pos_emb_kernel_packed(%arg0: i32, %arg1: memref<2x128xf32, #tpu.memory_space<vmem>>, %arg2: memref<2x128xf32, #tpu.memory_space<vmem>>) attributes {dimension_semantics = [#tpu.dimension_semantics<parallel>], iteration_bounds = array<i64: 1>, scalar_prefetch = 0 : i64, scratch_operands = 0 : i64, tpu.core_type = #tpu.core_type<tc>, window_params = [{pipeline_mode = #tpu.pipeline_mode<synchronous>, transform_indices = @transform_0, window_bounds = array<i64: 2, 128>}, {transform_indices = @transform_1, window_bounds = array<i64: 2, 128>}]} {
    %c2_i32 = arith.constant 2 : i32
    %0 = arith.muli %arg0, %c2_i32 : i32
    %1 = tpu.iota {dimensions = array<i32: 0>} : vector<2x128xi32>
    %2 = vector.broadcast %0 : i32 to vector<2x128xi32>
    %3 = arith.addi %1, %2 : vector<2x128xi32>
    %4 = tpu.iota {dimensions = array<i32: 1>} : vector<2x128xi32>
    %c4_i32 = arith.constant 4 : i32
    %5 = vector.broadcast %c4_i32 : i32 to vector<2x128xi32>
    %6 = arith.muli %3, %5 : vector<2x128xi32>
    %c5_i32 = arith.constant 5 : i32
    %7 = vector.broadcast %c5_i32 : i32 to vector<2x128xi32>
    %8 = arith.shrsi %4, %7 : vector<2x128xi32>
    %9 = arith.addi %6, %8 : vector<2x128xi32>
    %10 = arith.sitofp %9 : vector<2x128xi32> to vector<2x128xf32>
    %c0 = arith.constant 0 : index
    %c0_0 = arith.constant 0 : index
    %11 = vector.load %arg1[%c0, %c0_0] : memref<2x128xf32, #tpu.memory_space<vmem>>, vector<1x128xf32>
    %c1 = arith.constant 1 : index
    %c0_1 = arith.constant 0 : index
    %12 = vector.load %arg1[%c1, %c0_1] : memref<2x128xf32, #tpu.memory_space<vmem>>, vector<1x128xf32>
    %13 = vector.broadcast %11 : vector<1x128xf32> to vector<2x128xf32>
    %14 = arith.mulf %10, %13 : vector<2x128xf32>
    %15 = vector.broadcast %12 : vector<1x128xf32> to vector<2x128xf32>
    %16 = arith.addf %14, %15 : vector<2x128xf32>
    %17 = math.sin %16 : vector<2x128xf32>
    %c0_2 = arith.constant 0 : index
    %c0_3 = arith.constant 0 : index
    %18 = vector.load %arg2[%c0_2, %c0_3] : memref<2x128xf32, #tpu.memory_space<vmem>>, vector<2x128xf32>
    tpu.vector_store %arg2[%c0_2, %c0_3], %17 {strides = array<i32>} : memref<2x128xf32, #tpu.memory_space<vmem>>, vector<2x128xf32>,
    return
  }
  func.func @transform_0(%arg0: i32) -> (i32, i32) {
    %c0_i32 = arith.constant 0 : i32
    %c0_i32_0 = arith.constant 0 : i32
    %c0_i32_1 = arith.constant 0 : i32
    return %c0_i32, %c0_i32_0 : i32, i32
  }
  func.func @transform_1(%arg0: i32) -> (i32, i32) {
    %c0_i32 = arith.constant 0 : i32
    %c0_i32_0 = arith.constant 0 : i32
    return %arg0, %c0_i32 : i32, i32
  }
}

</mosaic_0001>

<bundles_post_ra>
// kernel: tpu_custom_call.1
= control target key start
LH: loop header
LB: loop body
LE: loop exit
PB: predicated region body
PF: predicated region fallthrough
CT: control target
= control target key end

     0   :  { %6 = vsyncpa [#allocation3], 0  ;;  %s297_s0 = inlined_call_operand.hbm [shape: f32[2,128], index: 0, kind: input, shape index: {}]   ;;  %s298_s1 = inlined_call_operand.hbm [shape: f32[2,128], index: 1, kind: output, shape index: {}]  }
   0x1   :  { %7 = vsyncpa [#allocation4], 0  ;;  %s234_s6 = smov [#allocation2]   ;;  %s186_s10 = scalar_lea.hbm %s297_s0, 32 }
   0x2   :  { %s14_s7 = sshll.u32 %s234_s6, 4  ;;  %p187_p0 = scmp.ne.s32.totalorder %s297_s0, %s186_s10  ;;  %s15_s7 = int_to_ptr.vmem [resolvable:$true] %s14_s7 }
   0x3   :  { %p190_p1 = scmp.lt.u32.totalorder %s186_s10, %s297_s0 }
   0x5   :  { %p192_p2 = pnand %p190_p1, %p187_p0 }
   0x7   :  { %195 = shalt.err (!%p192_p2)
}
   0x8   :  { %s196_s15 = scalar_lea.vmem %s15_s7, 32  ;;  %p201_p4 = scmp.lt.s32.totalorder %s15_s7, %s15_s7 }
   0x9   :  { %p197_p3 = scmp.ne.s32.totalorder %s15_s7, %s196_s15  ;;  %p202_p5 = scmp.lt.s32.totalorder %s196_s15, %s196_s15 }
   0xb   :  { %p203_p6 = por %p202_p5, %p201_p4 }
   0xd   :  { %p204_p7 = pnand %p203_p6, %p197_p3 }
   0xf   :  { %207 = shalt.err (!%p204_p7)
}
  0x10   :  { %17 = dma.hbm_to_vmem [thread:$0]  %s297_s0, 32, %s15_s7, [#allocation3]  }
  0x11   :  { %230 = dma.done.wait [#allocation3], 32  }
  0x12   :  { %231 = vsyncadd [#allocation3], 4294967264  ;;  %v22_v0 = vlaneseq  ;;  %v164_v6 = vld [vmem:[#allocation2] ss:$0 sm:$0xff]  ;;  %v165_v8 = vld [vmem:[#allocation2 + $0x1] ss:$0 sm:$0xff] }
  0x13   :  { %v235_v22 = vmov 683565275   ;;  %v236_v24 = vmov 2475754826   ;;  %v237_v26 = vmov 2131351028  }
  0x14   :  { %v23_v1 = vshrl.u32 %v22_v0, 7  ;;  %v27_v2 = vand.u32 127, %v22_v0  ;;  %v238_v28 = vmov 2102212464   ;;  %v239_v30 = vmov 920167782  }
  0x15   :  { %v240_v37 = vmov 1326507024   ;;  %s241_s0 = smov [#allocation5]  }
  0x16   :  { %v28_v3 = vmul.u32 4, %v23_v1  ;;  %v29_v4 = vshra.s32 %v27_v2, 5  ;;  %s155_s18 = sshll.u32 %s241_s0, 4  ;;  %s156_s18 = int_to_ptr.vmem [resolvable:$true] %s155_s18 }
  0x17   :  { %s208_s19 = scalar_lea.vmem %s156_s18, 32  ;;  %p213_p9 = scmp.lt.s32.totalorder %s156_s18, %s156_s18 }
  0x18   :  { %v30_v5 = vadd.s32 %v29_v4, %v28_v3  ;;  %p209_p8 = scmp.ne.s32.totalorder %s156_s18, %s208_s19  ;;  %p214_p10 = scmp.lt.s32.totalorder %s208_s19, %s208_s19 }
  0x1a   :  { %v31_v7 = vcvt.s32.f32 %v30_v5  ;;  %p215_p11 = por %p214_p10, %p213_p9 }
  0x1c   :  { %v38_v9 = vmul.f32 %v164_v6, %v31_v7  ;;  %p216_p12 = pnand %p215_p11, %p209_p8 }
  0x1e   :  { %v264_v10 = vadd.f32 %v165_v8, %v38_v9 }
  0x20   :  { %v47_v11 = vand.u32 2139095040, %v264_v10  ;;  %v44_v13 = vand.u32 2147483647, %v264_v10  ;;  %vm46_vm7 = vcmp.lt.s32.totalorder %v264_v10, 0  ;;  %vm136_vm12 = vweird.f32 %v264_v10 }
  0x22   :  { %v48_v12 = vshrl.u32 %v47_v11, 23  ;;  %v51_v16 = vand.u32 8388607, %v44_v13  ;;  %vm45_vm8 = vcmp.le.f32.partialorder %v44_v13, 0.7853982 }
  0x24   :  { %v166_v14 = vadd.s32 4294967169, %v48_v12  ;;  %v52_v19 = vor.u32 8388608, %v51_v16 }
  0x26   :  { %v54_v15 = vadd.s32 1, %v166_v14  ;;  %v92_v39 = vshll.u32 %v52_v19, 8 }
  0x28   :  { %vm55_vm0 = vcmp.gt.s32.totalorder %v54_v15, 0 }
  0x29   :  { %v56_v17 = vsel %vm55_vm0, %v54_v15, 0 }
  0x2a   :  { %v58_v18 = vand.u32 31, %v56_v17  ;;  %v57_v20 = vshrl.u32 %v56_v17, 5 }
  0x2c   :  { %v59_v21 = vsub.s32 32, %v58_v18  ;;  %v61_v23 = vshll.u32 %v235_v22, %v58_v18  ;;  %v64_v25 = vshll.u32 %v236_v24, %v58_v18  ;;  %v67_v27 = vshll.u32 %v237_v26, %v58_v18 }
  0x2d   :  { %v70_v29 = vshll.u32 %v238_v28, %v58_v18  ;;  %v73_v31 = vshll.u32 %v239_v30, %v58_v18  ;;  %vm76_vm1 = vcmp.lt.s32.totalorder %v57_v20, 1  ;;  %vm79_vm2 = vcmp.lt.s32.totalorder %v57_v20, 4 }
  0x2e   :  { %v60_v32 = vshrl.u32 %v235_v22, %v59_v21  ;;  %v62_v33 = vshrl.u32 %v236_v24, %v59_v21  ;;  %v65_v34 = vshrl.u32 %v237_v26, %v59_v21  ;;  %v68_v35 = vshrl.u32 %v238_v28, %v59_v21 }
  0x2f   :  { %v71_v36 = vshrl.u32 %v239_v30, %v59_v21  ;;  %v74_v38 = vshrl.u32 %v240_v37, %v59_v21  ;;  %vm77_vm3 = vcmp.lt.s32.totalorder %v57_v20, 2  ;;  %vm78_vm4 = vcmp.lt.s32.totalorder %v57_v20, 3 }
  0x30   :  { %v63_v40 = vor.u32 %v62_v33, %v61_v23  ;;  %v66_v41 = vor.u32 %v65_v34, %v64_v25  ;;  %v69_v42 = vor.u32 %v68_v35, %v67_v27 }
  0x31   :  { %v72_v43 = vor.u32 %v71_v36, %v70_v29  ;;  %v75_v44 = vor.u32 %v74_v38, %v73_v31 }
  0x32   :  { %v80_v45 = vsel %vm76_vm1, %v60_v32, %v63_v40  ;;  %v81_v46 = vsel %vm79_vm2, %v69_v42, 2102212464  ;;  %v84_v47 = vsel %vm76_vm1, %v63_v40, %v66_v41  ;;  %v88_v48 = vsel %vm76_vm1, %v66_v41, %v69_v42 }
  0x33   :  { %v82_v49 = vsel %vm78_vm4, %v66_v41, %v81_v46  ;;  %v85_v50 = vsel %vm79_vm2, %v72_v43, 920167782  ;;  %v89_v51 = vsel %vm79_vm2, %v75_v44, 1326507024 }
  0x34   :  { %v86_v52 = vsel %vm78_vm4, %v69_v42, %v85_v50  ;;  %v90_v53 = vsel %vm78_vm4, %v72_v43, %v89_v51  ;;  %v83_v54 = vsel %vm77_vm3, %v80_v45, %v82_v49 }
  0x35   :  { %v87_v55 = vsel %vm77_vm3, %v84_v47, %v86_v52  ;;  %v91_v56 = vsel %vm77_vm3, %v88_v48, %v90_v53  ;;  %v99_v61 = vmul.u32 %v92_v39, %v83_v54 }
  0x36   :  { %v270_v57 = vmul.u32.u64.low %v92_v39, %v91_v56  ;;  %v271_v58 = vmul.u32.u64.high %v92_v39, %v91_v56, %v270_v57  ;;  %v273_v59 = vmul.u32.u64.low %v92_v39, %v87_v55  ;;  %v274_v60 = vmul.u32.u64.high %v92_v39, %v87_v55, %v273_v59 }
  0x38   :  { %vm101_vm5 = vc.u32 %v271_v58, %v273_v59  ;;  %v102_v62 = vadd.s32 1, %v274_v60  ;;  %v100_v9 = vadd.s32 %v273_v59, %v271_v58 }
  0x3a   :  { %v103_v63 = vsel %vm101_vm5, %v102_v62, %v274_v60 }
  0x3b   :  { %v104_v0 = vadd.s32 %v103_v63, %v99_v61 }
  0x3d   :  { %v105_v1 = vadd.s32 536870912, %v104_v0 }
  0x3f   :  { %v106_v2 = vshrl.u32 %v105_v1, 30 }
  0x41   :  { %v107_v3 = vshll.u32 %v106_v2, 30  ;;  %v130_v23 = vsub.s32 4, %v106_v2 }
  0x43   :  { %v108_v4 = vsub.s32 %v104_v0, %v107_v3  ;;  %v131_v26 = vsel %vm46_vm7, %v130_v23, %v106_v2 }
  0x44   :  { %v133_v29 = vsel %vm45_vm8, 0, %v131_v26 }
  0x45   :  { %v110_v5 = vsub.s32 0, %v108_v4  ;;  %v137_v30 = vadd.s32 3, %v133_v29 }
  0x47   :  { %v167_v6 = vmin.u32 %v110_v5, %v108_v4  ;;  %v138_v31 = vand.u32 3, %v137_v30 }
  0x49   :  { %v112_v7 = vclz %v167_v6  ;;  %vm143_vm9 = vcmp.eq.s32.totalorder %v138_v31, 2  ;;  %vm140_vm10 = vcmp.eq.s32.totalorder %v138_v31, 0  ;;  %vm139_vm11 = vcmp.lt.s32.totalorder %v138_v31, 2 }
  0x4b   :  { %v168_v8 = vadd.s32 4294967294, %v112_v7 }
  0x4d   :  { %vm169_vm6 = vcmp.lt.s32.totalorder %v168_v8, 0 }
  0x4e   :  { %v115_v11 = vsel %vm169_vm6, 0, %v168_v8 }
  0x4f   :  { %v116_v12 = vsub.s32 32, %v115_v11  ;;  %v117_v14 = vshll.u32 %v108_v4, %v115_v11  ;;  %v120_v15 = vsub.s32 4294967266, %v115_v11 }
  0x51   :  { %v118_v16 = vshrl.u32 %v100_v9, %v116_v12  ;;  %v121_v17 = vadd.s32 127, %v120_v15 }
  0x53   :  { %v119_v18 = vor.u32 %v118_v16, %v117_v14  ;;  %v122_v19 = vshll.u32 %v121_v17, 23 }
  0x55   :  { %v123_v20 = vor.u32 4788187, %v122_v19  ;;  %v126_v21 = vcvt.s32.f32 %v119_v18 }
  0x57   :  { %v124_v22 = vand.u32 2147483647, %v123_v20 }
  0x59   :  { %v127_v24 = vmul.f32 %v126_v21, %v124_v22 }
  0x5b   :  { %v128_v25 = vxor.u32 2147483648, %v127_v24 }
  0x5d   :  { %v129_v27 = vsel %vm46_vm7, %v128_v25, %v127_v24 }
  0x5e   :  { %v132_v28 = vsel %vm45_vm8, %v264_v10, %v129_v27 }
  0x5f   :  { %182 = vcosq.f32 %v132_v28 }
  0x60   :  { %184 = vsinq.f32 %v132_v28 }
  0x69   :  { %v183_v32 = vpop.eup %182 }
  0x6a   :  { %v185_v33 = vpop.eup %184  ;;  %v144_v34 = vxor.u32 2147483648, %v183_v32 }
  0x6b   :  { %v141_v35 = vxor.u32 2147483648, %v185_v33 }
  0x6c   :  { %v145_v13 = vsel %vm143_vm9, %v144_v34, %v185_v33 }
  0x6d   :  { %v142_v36 = vsel %vm140_vm10, %v183_v32, %v141_v35 }
  0x6e   :  { %v146_v37 = vsel %vm139_vm11, %v142_v36, %v145_v13 }
  0x6f   :  { %v147_v38 = vsel %vm136_vm12, nan, %v146_v37 }
  0x70   :  { %148 = vst [vmem:[#allocation5] sm:$0x3] %v147_v38 }
  0x71   :  { %219 = shalt.err (!%p216_p12)
}
  0x72   :  { %s220_s22 = scalar_lea.hbm %s298_s1, 32 }
  0x73   :  { %p221_p13 = scmp.ne.s32.totalorder %s298_s1, %s220_s22  ;;  %p224_p0 = scmp.lt.u32.totalorder %s220_s22, %s298_s1 }
  0x75   :  { %p226_p1 = pnand %p224_p0, %p221_p13 }
  0x77   :  { %229 = shalt.err (!%p226_p1)
}
  0x78   :  { %158 = dma.vmem_to_hbm [thread:$0]  %s156_s18, 32, %s298_s1, [#allocation4]  }
  0x79   :  { %232 = dma.done.wait [#allocation4], 32  }
  0x7a   :  { %233 = vsyncadd [#allocation4], 4294967264 }
  0x7b   :  { %162 = vsyncpa [#allocation3], 1 }
  0x7c   :  { %163 = vsyncpa [#allocation4], 1 }

</bundles_post_ra>
